<compile_context>
chip_gen: v6e
topology: v6e:2x2x1
jax: 0.10.0
libtpu: 0.0.40
codegen_flags: <defaults>
</compile_context>

<pallas_src>
import jax
import jax.numpy as jnp
from jax.experimental import pallas as pl
from jax.experimental.pallas import tpu as pltpu


def _round_up(a: int, b: int) -> int:
    return (a + b - 1) // b * b


def _round_down(a: int, b: int) -> int:
    return (a // b) * b


def _cdiv(a: int, b: int) -> int:
    return (a + b - 1) // b


def _vmem_limit_bytes() -> int:
    """Per-generation scoped-VMEM budget (with headroom below physical)."""
    try:
        kind = jax.devices()[0].device_kind.lower()
    except Exception:  # pragma: no cover - defensive
        kind = ""
    if "v7" in kind or "7x" in kind:
        return 48 * 1024 * 1024   # v7x: 64 MiB physical per TensorCore
    if "v6" in kind or "v5" in kind or "v4" in kind:
        return 96 * 1024 * 1024   # v5e/v6e: 128 MiB physical
    return 32 * 1024 * 1024       # conservative fallback


def _cls_head_kernel(x_ref, wt_ref, b_ref, o_ref):
    # x_ref: (TM, K)  wt_ref: (K, N_out)  b_ref: (1, N_out)  o_ref: (TM, N_out)
    acc = jnp.dot(x_ref[...], wt_ref[...], preferred_element_type=jnp.float32)
    o_ref[...] = (acc + b_ref[...]).astype(o_ref.dtype)


def classification_head(x, weight, bias):
    """x: (..., input_dim); weight: (num_classes, input_dim);
    bias: (num_classes,).  Returns (..., num_classes)."""
    *lead, k = x.shape
    n = weight.shape[0]
    m = 1
    for d in lead:
        m *= d
    bs = jnp.dtype(x.dtype).itemsize

    # ---- output lane layout: pad N to 128 only when write bytes are cheap ---
    if n % 128 == 0:
        n_out = n
    elif k >= 512:
        n_out = _round_up(n, 128)   # lane-dense unmasked vst, padding is noise
    else:
        n_out = n                   # small K: don't inflate HBM writeback

    # ---- TM from a VMEM byte budget (per generation) ------------------------
    vmem_limit = _vmem_limit_bytes()
    ws_budget = int(vmem_limit * 0.8)
    resident_bytes = (k * n_out + n_out) * bs            # weight + bias (1 copy)
    per_row_bytes = 2 * bs * (k + n_out)                 # x + out double-buffers
    tm = (ws_budget - resident_bytes) // max(per_row_bytes, 1)
    tm = _round_down(max(tm, 8), 8)
    tm = min(tm, 8192)
    # Give the 2 TensorCores on v7x at least one block each (harmless on 1-TC).
    tm = min(tm, _round_up(max(_cdiv(m, 2), 1), 8))
    tm = max(tm, 8)
    grid_m = _cdiv(m, tm)           # ragged last block handled by Pallas masking

    # ---- wrapper-side layout plumbing (no copy of x) -------------------------
    x2d = x.reshape(m, k)
    wt = weight.T                                  # (K, N)
    b2d = bias.reshape(1, n)
    if n_out != n:
        wt = jnp.pad(wt, ((0, 0), (0, n_out - n)))
        b2d = jnp.pad(b2d, ((0, 0), (0, n_out - n)))

    cost = pl.CostEstimate(
        flops=2 * m * k * n_out,
        transcendentals=0,
        bytes_accessed=(m * k + k * n_out + n_out + m * n_out) * bs,
    )

    out = pl.pallas_call(
        _cls_head_kernel,
        out_shape=jax.ShapeDtypeStruct((m, n_out), x.dtype),
        grid_spec=pltpu.PrefetchScalarGridSpec(
            num_scalar_prefetch=0,
            grid=(grid_m,),
            in_specs=[
                # x streams over M, pipelined per grid step.
                pl.BlockSpec((tm, k), lambda i: (i, 0)),
                # weight + bias are VMEM-resident across the whole grid.
                pl.BlockSpec((k, n_out), lambda i: (0, 0)),
                pl.BlockSpec((1, n_out), lambda i: (0, 0)),
            ],
            out_specs=pl.BlockSpec((tm, n_out), lambda i: (i, 0)),
        ),
        compiler_params=pltpu.CompilerParams(
            dimension_semantics=("parallel",),
            vmem_limit_bytes=vmem_limit,
        ),
        cost_estimate=cost,
    )(x2d, wt, b2d)

    if n_out != n:
        out = out[:, :n]
    return out.reshape(*lead, n)


if __name__ == "__main__":
    key = jax.random.PRNGKey(0)
    k_x, k_w, k_b = jax.random.split(key, 3)

    batch, seq, input_dim, num_classes = 2, 8, 32, 10

    x = jax.random.normal(k_x, (batch, seq, input_dim), dtype=jnp.float32)
    # Deterministic "init" mimicking nn.Linear's uniform(-1/sqrt(K), 1/sqrt(K))
    bound = 1.0 / (input_dim ** 0.5)
    weight = jax.random.uniform(k_w, (num_classes, input_dim),
                                minval=-bound, maxval=bound, dtype=jnp.float32)
    # Module explicitly ties cls.bias to a zero-initialized Parameter.
    bias = jnp.zeros((num_classes,), dtype=jnp.float32)

    out = classification_head(x, weight, bias)
    out = jax.block_until_ready(out)

    # Reference check in plain JAX (same semantics as PyTorch eval forward).
    ref = x @ weight.T + bias
    assert out.shape == (batch, seq, num_classes)
    assert jnp.allclose(out, ref, atol=1e-5, rtol=1e-5)

    print("KERNEL_OK")
</pallas_src>

<mosaic_0001>
module attributes {stable_mosaic.version = 11 : i64} {
  func.func @_cls_head_kernel(%arg0: i32, %arg1: memref<8x32xf32, #tpu.memory_space<vmem>>, %arg2: memref<32x10xf32, #tpu.memory_space<vmem>>, %arg3: memref<1x10xf32, #tpu.memory_space<vmem>>, %arg4: memref<8x10xf32, #tpu.memory_space<vmem>>) attributes {dimension_semantics = [#tpu.dimension_semantics<parallel>], iteration_bounds = array<i64: 2>, scalar_prefetch = 0 : i64, scratch_operands = 0 : i64, tpu.core_type = #tpu.core_type<tc>, window_params = [{transform_indices = @transform_0, window_bounds = array<i64: 8, 32>}, {pipeline_mode = #tpu.pipeline_mode<synchronous>, transform_indices = @transform_1, window_bounds = array<i64: 32, 10>}, {pipeline_mode = #tpu.pipeline_mode<synchronous>, transform_indices = @transform_2, window_bounds = array<i64: 1, 10>}, {transform_indices = @transform_3, window_bounds = array<i64: 8, 10>}]} {
    %c0 = arith.constant 0 : index
    %c0_0 = arith.constant 0 : index
    %0 = vector.load %arg1[%c0, %c0_0] : memref<8x32xf32, #tpu.memory_space<vmem>>, vector<8x32xf32>
    %c0_1 = arith.constant 0 : index
    %c0_2 = arith.constant 0 : index
    %1 = vector.load %arg2[%c0_1, %c0_2] : memref<32x10xf32, #tpu.memory_space<vmem>>, vector<32x10xf32>
    %cst = arith.constant dense<0.000000e+00> : vector<8x10xf32>
    %2 = tpu.matmul %0, %1, %cst {dimension_numbers = #tpu.dot_dimension_numbers<[1], [0], [0], [1], [0, 0, 1, 1], [], []>} : vector<8x32xf32>, vector<32x10xf32>, vector<8x10xf32> -> vector<8x10xf32>
    %c0_3 = arith.constant 0 : index
    %c0_4 = arith.constant 0 : index
    %3 = vector.load %arg3[%c0_3, %c0_4] : memref<1x10xf32, #tpu.memory_space<vmem>>, vector<1x10xf32>
    %4 = vector.broadcast %3 : vector<1x10xf32> to vector<8x10xf32>
    %5 = arith.addf %2, %4 : vector<8x10xf32>
    %c0_5 = arith.constant 0 : index
    %c0_6 = arith.constant 0 : index
    %6 = vector.load %arg4[%c0_5, %c0_6] : memref<8x10xf32, #tpu.memory_space<vmem>>, vector<8x10xf32>
    tpu.vector_store %arg4[%c0_5, %c0_6], %5 {strides = array<i32>} : memref<8x10xf32, #tpu.memory_space<vmem>>, vector<8x10xf32>,
    return
  }
  func.func @transform_0(%arg0: i32) -> (i32, i32) {
    %c0_i32 = arith.constant 0 : i32
    %c0_i32_0 = arith.constant 0 : i32
    return %arg0, %c0_i32 : i32, i32
  }
  func.func @transform_1(%arg0: i32) -> (i32, i32) {
    %c0_i32 = arith.constant 0 : i32
    %c0_i32_0 = arith.constant 0 : i32
    %c0_i32_1 = arith.constant 0 : i32
    return %c0_i32, %c0_i32_0 : i32, i32
  }
  func.func @transform_2(%arg0: i32) -> (i32, i32) {
    %c0_i32 = arith.constant 0 : i32
    %c0_i32_0 = arith.constant 0 : i32
    %c0_i32_1 = arith.constant 0 : i32
    return %c0_i32, %c0_i32_0 : i32, i32
  }
  func.func @transform_3(%arg0: i32) -> (i32, i32) {
    %c0_i32 = arith.constant 0 : i32
    %c0_i32_0 = arith.constant 0 : i32
    return %arg0, %c0_i32 : i32, i32
  }
}

</mosaic_0001>

<bundles_post_ra>
// kernel: tpu_custom_call.1
= control target key start
LH: loop header
LB: loop body
LE: loop exit
PB: predicated region body
PF: predicated region fallthrough
CT: control target
= control target key end

     0   :  { %8 = vsyncpa [#allocation3], 0  ;;  %s589_s0 = inlined_call_operand.vmem [shape: f32[16,32], index: 0, kind: input, shape index: {}]   ;;  %s590_s1 = inlined_call_operand.vmem [shape: f32[32,10], index: 1, kind: input, shape index: {}]   ;;  %s591_s2 = inlined_call_operand.vmem [shape: f32[1,10], index: 2, kind: input, shape index: {}]   ;;  %s592_s3 = inlined_call_operand.hbm [shape: f32[16,10], index: 3, kind: output, shape index: {}]  }
   0x1   :  { %10 = vsyncpa [#allocation3 + $0x1], 0  ;;  %s481_s12 = smov 0   ;;  %s483_s13 = smov 0  }
   0x2   :  { %s485_s14 = smov 0   ;;  %s487_s15 = smov 0  }
   0x3 LB: > { %s502_s16 = sadd.s32 4294967295, %s456_s15   ;;  %s327_s17 = sadd.s32 4294967294, %s456_s15   ;;  %s456_s15 = sphi %s487_s15, %s598_s15   ;;  %s452_s14 = sphi %s485_s14, %s597_s14   ;;  %s448_s13 = sphi %s483_s13, %s596_s13   ;;  %s444_s12 = sphi %s481_s12, %s595_s12  }
   0x4   : > { %s506_s18 = sadd.s32 1, %s456_s15   ;;  %s91_s19 = sadd.s32 1, %s452_s14 }
   0x5   : > { %s88_s20 = ssub.s32 %s456_s15, %s506_s18  ;;  %p101_p0 = scmp.ne.s32.totalorder %s452_s14, %s448_s13 }
   0x6   : > { %p89_p1 = scmp.eq.s32.totalorder %s88_s20, 0  ;;  %p102_p2 = scmp.eq.s32.totalorder %s502_s16, 1 }
   0x7   : > { %p107_p3 = scmp.ne.s32.totalorder %s448_s13, %s444_s12  ;;  %p108_p4 = scmp.eq.s32.totalorder %s327_s17, 1 }
   0x8   : > { %s517_s21 = scalar_select %p89_p1, %s452_s14, %s91_s19  }
   0x9   : > { %p519_p5 = por %p102_p2, %p101_p0  ;;  %p523_p6 = por %p108_p4, %p107_p3 }
   0xa   : > { %p330_p7 = scmp.ge.s32.totalorder %s456_s15, 1  ;;  %p139_p8 = scmp.lt.s32.totalorder %s456_s15, 3 }
   0xc   : > { %p140_p9 = pnand %p330_p7, %p139_p8 }
   0xd   : > { %p162_p10 = scmp.lt.s32.totalorder (!%p140_p9), %s502_s16, 1  ;;  %s159_s10 = sand.u32 (!%p140_p9), 1, %s448_s13  }
   0xe   : > { %143 = sbr.rel (%p140_p9) target bundleno = 236 (0xec), region = 32  ;;  %s331_s11 = sshll.u32 (!%p140_p9), %s159_s10, 3 }
   0xf   : > { %s336_s20 = sshll.u32 (!%p140_p9), %s502_s16, 7  ;;  %s161_s24 = scalar_lea.vmem (!%p140_p9), [#allocation2], %s331_s11 }
  0x10   : > { %s268_s25 = sshll.u32 (!%p140_p9), %s161_s24, 4  ;;  %s255_s29 = scalar_lea.sflag (!%p140_p9), [#allocation3], %s159_s10  ;;  %s269_s25 = int_to_ptr.vmem [resolvable:$true] %s268_s25 }
  0x11   : > { %s396_s30 = scalar_lea.vmem (!%p140_p9), %s269_s25, 128 }
  0x12   : > { %p397_p11 = scmp.ne.s32.totalorder (!%p140_p9), %s269_s25, %s396_s30 }
  0x13   : > { %v170_v0 = vld [vmem:[%s590_s1 + $0x18] sm:$0xff]  ;;  %v458_v1 = vmov 0.0   ;;  %v169_v2 = vld [vmem:[%s590_s1 + $0x10] sm:$0xff]  ;;  %vm459_vm0 = vmmov 0   ;;  %s163_s28 = scalar_select %p162_p10, %s502_s16, 1  ;;  %v168_v3 = vld [vmem:[%s590_s1 + $0x8] sm:$0xff] }
  0x14   : > { %344 = vmatprep.subr.mxu0 %v458_v1  ;;  %352 = vmatprep.mubr.msk.f32.mxu0 %vm459_vm0, %v458_v1  ;;  %v167_v4 = vld [vmem:[%s590_s1] sm:$0xff]  ;;  %vm178_vm1 = vcmask 261120   ;;  %vm252_vm2 = vcmask 80896   ;;  %p398_p12 = pnand %p397_p11, %p519_p5  ;;  %s460_s16 = smov [#allocation2]  }
  0x15   : > { %345 = vmatpush3.msra.mxu0 %v170_v0  ;;  %s332_s4 = sshll.u32 %s163_s28, 3  ;;  %v333_v6 = vld [vmem:[%s591_s2] ss:$0 sm:$0xff]  ;;  %s554_s28 = scalar_lea.hbm %s592_s3, %s336_s20 }
  0x16   : > { %346 = vmatprep.subr.mxu0 %v458_v1  ;;  %s165_s9 = scalar_lea.vmem %s589_s0, %s332_s4  ;;  %p399_p13 = pneg %p398_p12 }
  0x17   : > { %347 = vmatpush3.msra.mxu0 %v169_v2  ;;  %v166_v5 = vld [vmem:[%s165_s9] sm:$0xff]  ;;  %s400_s4 = sshll.u32 %s460_s16, 4  ;;  %s401_s4 = int_to_ptr.vmem [resolvable:$false] %s400_s4 }
  0x18   : > { %348 = vmatprep.subr.mxu0 %v458_v1  ;;  %s402_s5 = scalar_lea.vmem %s401_s4, 256  ;;  %p403_p0 = scmp.lt.s32.totalorder %s269_s25, %s401_s4 }
  0x19   : > { %349 = vmatpush3.msra.mxu0 %v168_v3  ;;  %p404_p1 = scmp.lt.s32.totalorder %s402_s5, %s396_s30 }
  0x1a   : > { %350 = vmatprep.subr.mxu0 %v458_v1 }
  0x1b   : > { %351 = vmatpush3.msra.mxu0 %v167_v4  ;;  %p405_p2 = por %p404_p1, %p403_p0 }
  0x1c   : > { %353 = vmatmul.mubr.msk.f32.vlgmr.msra.gmra.mxu0 %vm178_vm1, %v166_v5 }
  0x1d   : > { %p406_p3 = pnand %p405_p2, %p399_p13 }
  0xdc   : > { %v248_v7 = vpop.f32.mrf.mxu0 }
  0xdd   : > { %v249_v8 = vadd.f32 %v333_v6, %v248_v7 }
  0xde   : > { %v354_v9 = vpop.f32.mrf.mxu0 }
  0xdf   : > { %253 = vst.msk [vmem:[%s161_s24] sm:$0xff] %vm252_vm2, %v249_v8 }
  0xe0   : > { %409 = shalt.err (!%p406_p3)
}
  0xe1   : > { %s410_s6 = scalar_lea.hbm %s554_s28, 128  ;;  %s414_s9 = scalar_lea.hbm %s592_s3, 256 }
  0xe2   : > { %p411_p4 = scmp.ne.s32.totalorder %s554_s28, %s410_s6  ;;  %p415_p9 = scmp.lt.s32.totalorder %s554_s28, %s592_s3 }
  0xe3   : > { %p416_p10 = scmp.lt.s32.totalorder %s414_s9, %s410_s6 }
  0xe4   : > { %p412_p7 = pnand %p411_p4, %p519_p5 }
  0xe5   : > { %p417_p11 = por %p416_p10, %p415_p9 }
  0xe6   : > { %p413_p8 = pneg %p412_p7 }
  0xe8   : > { %p418_p12 = pnand %p417_p11, %p413_p8 }
  0xea   : > { %421 = shalt.err (!%p418_p12)
}
  0xeb   : > { %355 = dma.vmem_to_hbm [thread:$0]  (%p519_p5), %s269_s25, 128, %s554_s28, %s255_s29  }
  0xec PF: > { %p361_p13 = scmp.ge.s32.totalorder %s456_s15, 2  ;;  %s280_s17 = sand.u32 1, %s444_s12  }
  0xed   : > { %s281_s19 = scalar_lea.sflag [#allocation3], %s280_s17 }
  0xee   : > { %p358_p0 = pnand %p361_p13, %p523_p6 }
  0xf0   : > { %p359_p1 = pneg %p358_p0 }
  0xf2   : > { %439 = dma.done.wait (%p359_p1), %s281_s19, 128  }
  0xf3   : > { %441 = vsyncadd (%p359_p1), %s281_s19, 4294967168  ;;  %p13_p2 = scmp.ge.s32.totalorder %s506_s18, 4   ;;  %s595_s12 = smov %s448_s13 }
  0xf4   : > { %s596_s13 = smov %s452_s14  ;;  %s597_s14 = smov %s517_s21 }
  0xf5   : > { %s598_s15 = smov %s506_s18  ;;  %15 = sbr.rel (!%p13_p2) target bundleno = 3 (0x3), region = 67 }
  0xfa   :  { %286 = vsyncpa [#allocation3], 1 }
  0xfb   :  { %288 = vsyncpa [#allocation3 + $0x1], 1 }

</bundles_post_ra>
